<compile_context>
chip_gen: v6e
topology: v6e:2x2x1
jax: 0.10.0
libtpu: 0.0.40
codegen_flags: <defaults>
</compile_context>

<pallas_src>
import functools

import jax
import jax.numpy as jnp
from jax.experimental import pallas as pl
from jax.experimental.pallas import tpu as pltpu


# ---------------------------------------------------------------------------
# Kernels: fused matmul + folded-BN bias + ReLU
# ---------------------------------------------------------------------------
def _fused_kernel(x_ref, w_ref, b_ref, o_ref):
    """Single-K-step variant (no scratch).  Compute-dtype cast happens in VMEM."""
    acc = jnp.dot(x_ref[...].astype(w_ref.dtype), w_ref[...],
                  preferred_element_type=jnp.float32)
    o_ref[...] = jnp.maximum(acc + b_ref[...], 0.0).astype(o_ref.dtype)


def _fused_kernel_acc(x_ref, w_ref, b_ref, o_ref, acc_ref):
    """K-tiled variant: grid axis 2 is the contraction; f32 accumulator scratch."""
    k = pl.program_id(2)

    @pl.when(k == 0)
    def _():
        acc_ref[...] = jnp.zeros_like(acc_ref)

    acc_ref[...] += jnp.dot(x_ref[...].astype(w_ref.dtype), w_ref[...],
                            preferred_element_type=jnp.float32)

    @pl.when(k == pl.num_programs(2) - 1)
    def _():
        o_ref[...] = jnp.maximum(acc_ref[...] + b_ref[...], 0.0).astype(o_ref.dtype)


# ---------------------------------------------------------------------------
# Tiling helpers
# ---------------------------------------------------------------------------
def _round_up(x, m):
    return ((x + m - 1) // m) * m


def _divisor_tile(dim, max_tile, align):
    """Largest tile <= max_tile that divides `dim` and is a multiple of `align`
    (or the whole dim when it already fits / no aligned divisor exists)."""
    if dim <= max_tile:
        return dim
    t = (max_tile // align) * align
    while t >= align:
        if dim % t == 0:
            return t
        t -= align
    return dim


def _pick_row_tile(rows):
    """Ensure >= 2 grid steps for medium problems (v7x megacore sharding); use
    512-row tiles for large ones (~85% of HBM roofline per tile measurements)."""
    if rows <= 256:
        return _round_up(rows, 8)
    if rows <= 2048:
        return _round_up((rows + 1) // 2, 8)
    return 512


def _vmem_limit_bytes():
    """Raise the scoped-VMEM ceiling (v5e default is only 16 MiB of 128 MiB) while
    keeping headroom under v7x's 64 MiB physical VMEM."""
    cap = 128 * 1024 * 1024
    try:
        cap = int(getattr(pltpu.get_tpu_info(), "vmem_capacity_bytes", cap))
    except Exception:
        pass
    return int(min(cap * 3 // 4, 100 * 1024 * 1024))


def _spec(shape, index_map, single_buffer):
    if single_buffer:
        # Grid-invariant operand: no point double-buffering it (halves footprint).
        return pl.BlockSpec(shape, index_map, pipeline_mode=pl.Buffered(1))
    return pl.BlockSpec(shape, index_map)


# ---------------------------------------------------------------------------
# One-time parameter folding (hoisted out of the per-forward hot path)
# ---------------------------------------------------------------------------
def prepare_shuffle_unit_params(weight, gamma, beta, running_mean, running_var,
                                *, groups, width, eps=1e-5,
                                compute_dtype=jnp.bfloat16):
    """Fold grouped-conv weight, eval-mode BN and the channel shuffle into one
    dense (K, N) matrix + (1, N) f32 bias row.  Call ONCE per parameter set.

    Returns (w_mat, bias_row, kron):
      kron=True  -> K = width*cin, N = width*cout   (lane-dense path, tiny C)
      kron=False -> K = cin,       N = cout         (flat path, cin >= 128)
    """
    f32 = jnp.float32
    cout, cipg, kh, kw = weight.shape
    assert kh == 1 and kw == 1, "ShuffleUnit uses a 1x1 conv"
    cin = cipg * groups
    assert cout % groups == 0
    copg = cout // groups
    cpg = cin // groups
    # The PyTorch `x.view(b, groups, c // groups, h, w)` (c = INPUT channels)
    # requires cout == groups*(cin//groups); other configs are unsupported.
    assert cout == groups * cpg, "shuffle view requires cout == groups*(cin//groups)"

    # 1. dense (cin, cout) weight, block-diagonal over groups (== grouped 1x1 conv).
    blocks = weight.astype(f32)[:, :, 0, 0].reshape(groups, copg, cipg)
    blocks = jnp.transpose(blocks, (0, 2, 1))                        # (g, cipg, copg)
    w_dense = jnp.einsum("gio,gh->giho", blocks,
                         jnp.eye(groups, dtype=f32)).reshape(cin, cout)

    # 2. fold eval-mode BN scale into the weight columns; keep the bias separate.
    # TODO(synk): if tolerance tightens, keep the weight unscaled in bf16 and apply
    #             the per-channel scale in the f32 epilogue instead.
    scale = gamma.astype(f32) / jnp.sqrt(running_var.astype(f32) + eps)
    bias = beta.astype(f32) - running_mean.astype(f32) * scale
    w_dense = w_dense * scale[None, :]

    # 3. fold the channel shuffle (output-channel permutation; commutes with ReLU).
    perm = jnp.arange(cout).reshape(groups, cout // groups).T.reshape(-1)
    w_dense = w_dense[:, perm]
    bias = bias[perm]

    # 4. matmul layout:
    #    cin < 128  -> Kronecker-expand over spatial W so lanes are dense (W*cin).
    #    cin >= 128 -> lanes already dense; fold W into rows, keep (cin, cout)
    #                  weight (no wasted MXU MACs, W^2x smaller resident weight).
    kron = (cin < 128) and (width * max(cin, cout) <= 2048)
    if kron:
        w_mat = jnp.kron(jnp.eye(width, dtype=f32), w_dense)        # (W*cin, W*cout)
        bias_row = jnp.tile(bias, (width,)).reshape(1, width * cout)
    else:
        w_mat = w_dense                                              # (cin, cout)
        bias_row = bias.reshape(1, cout)

    return w_mat.astype(compute_dtype), bias_row, kron


# ---------------------------------------------------------------------------
# Per-call forward (slab formation + one fused pallas_call)
# ---------------------------------------------------------------------------
def shuffle_unit_apply(x_nchw, w_mat, bias_row, *, kron, out_dtype=None):
    """Fused ShuffleUnit forward.  x_nchw: (N, C, H, W), matches PyTorch I/O.

    The activation is NOT pre-cast to the compute dtype here; the cast happens in
    VMEM inside the kernel.  A channels-last caller can skip the boundary
    transposes entirely by feeding the slab layout directly.
    """
    n, cin, h, wd = x_nchw.shape
    K, N = w_mat.shape
    out_dtype = x_nchw.dtype if out_dtype is None else out_dtype

    if kron:
        cout = N // wd
        # (N*H, W*Cin) slab: rows = n*h, lanes = w-major, channel-minor.
        x_slab = jnp.transpose(x_nchw, (0, 2, 3, 1)).reshape(n * h, wd * cin)
    else:
        cout = N
        # (N*H*W, Cin) slab.
        x_slab = jnp.transpose(x_nchw, (0, 2, 3, 1)).reshape(n * h * wd, cin)

    rows = x_slab.shape[0]
    row_tile = _pick_row_tile(rows)
    rows_padded = _round_up(rows, row_tile)
    if rows_padded != rows:
        x_slab = jnp.pad(x_slab, ((0, rows_padded - rows), (0, 0)))

    tk = _divisor_tile(K, 512, 128)       # contraction tile
    tn = _divisor_tile(N, 256, 128)       # output-lane tile (256-wide MXU v6e/v7x)
    grid = (rows_padded // row_tile, N // tn, K // tk)
    n_tiles, k_tiles = grid[1], grid[2]

    in_specs = [
        pl.BlockSpec((row_tile, tk), lambda r, j, k: (r, k)),
        _spec((tk, tn), lambda r, j, k: (k, j),
              single_buffer=(n_tiles == 1 and k_tiles == 1)),
        _spec((1, tn), lambda r, j, k: (0, j), single_buffer=(n_tiles == 1)),
    ]
    out_spec = pl.BlockSpec((row_tile, tn), lambda r, j, k: (r, j))

    if k_tiles == 1:
        kernel, scratch = _fused_kernel, []
    else:
        kernel, scratch = _fused_kernel_acc, [pltpu.VMEM((row_tile, tn), jnp.float32)]

    out_slab = pl.pallas_call(
        kernel,
        out_shape=jax.ShapeDtypeStruct((rows_padded, N), out_dtype),
        grid_spec=pltpu.PrefetchScalarGridSpec(
            num_scalar_prefetch=0,
            grid=grid,
            in_specs=in_specs,
            out_specs=out_spec,
            scratch_shapes=scratch,
        ),
        compiler_params=pltpu.CompilerParams(
            dimension_semantics=("parallel", "parallel", "arbitrary"),
            vmem_limit_bytes=_vmem_limit_bytes(),
        ),
    )(x_slab, w_mat, bias_row)

    out_slab = out_slab[:rows]
    # slab -> NHWC -> NCHW (PyTorch output convention).
    return out_slab.reshape(n, h, wd, cout).transpose(0, 3, 1, 2)


# ---------------------------------------------------------------------------
# Pure-JAX reference (ShuffleUnit.forward, eval-mode BN)
# ---------------------------------------------------------------------------
def shuffle_unit_reference(x, weight, gamma, beta, running_mean, running_var, *,
                           groups, eps=1e-5):
    y = jax.lax.conv_general_dilated(
        x, weight, window_strides=(1, 1), padding=[(0, 0), (0, 0)],
        dimension_numbers=("NCHW", "OIHW", "NCHW"),
        feature_group_count=groups)
    scale = gamma / jnp.sqrt(running_var + eps)
    bias = beta - running_mean * scale
    y = y * scale[None, :, None, None] + bias[None, :, None, None]
    y = jnp.maximum(y, 0.0)
    b, c, h, w = x.shape                  # c = INPUT channels, per the PyTorch code
    y = y.reshape(b, groups, c // groups, h, w)
    y = jnp.transpose(y, (0, 2, 1, 3, 4))
    return y.reshape(b, -1, h, w)


if __name__ == "__main__":
    # ShuffleUnit(in_channels=8, out_channels=8, groups=2) on a (2, 8, 16, 16) input.
    N, C, H, W = 2, 8, 16, 16
    GROUPS = 2

    key = jax.random.PRNGKey(0)
    kx, kw_, kg, kb, km, kv = jax.random.split(key, 6)

    x = jax.random.normal(kx, (N, C, H, W), dtype=jnp.float32)
    # Grouped Conv2d weight: (out_channels, in_channels // groups, 1, 1), bias=False.
    fan_in = C // GROUPS
    weight = jax.random.uniform(kw_, (C, C // GROUPS, 1, 1), dtype=jnp.float32,
                                minval=-1.0, maxval=1.0) / jnp.sqrt(fan_in)
    # Non-trivial eval-mode BatchNorm parameters (exercise the scale/bias fold).
    gamma = jax.random.uniform(kg, (C,), jnp.float32, 0.5, 1.5)
    beta = 0.1 * jax.random.normal(kb, (C,), jnp.float32)
    running_mean = 0.2 * jax.random.normal(km, (C,), jnp.float32)
    running_var = jax.random.uniform(kv, (C,), jnp.float32, 0.5, 1.5)

    # Parameter folding happens ONCE, outside the per-call hot path.
    w_mat, bias_row, kron = prepare_shuffle_unit_params(
        weight, gamma, beta, running_mean, running_var, groups=GROUPS, width=W)
    w_mat, bias_row = jax.block_until_ready((w_mat, bias_row))

    fwd = jax.jit(functools.partial(shuffle_unit_apply, kron=kron))
    out = jax.block_until_ready(fwd(x, w_mat, bias_row))

    ref = shuffle_unit_reference(x, weight, gamma, beta, running_mean,
                                 running_var, groups=GROUPS)
    assert out.shape == (N, C, H, W), out.shape
    # bf16 MXU operands with f32 accumulation -> loosened tolerance vs f32 reference.
    max_err = float(jnp.max(jnp.abs(out - ref)))
    assert jnp.allclose(out, ref, atol=2e-2, rtol=2e-2), \
        f"mismatch vs reference (max abs err {max_err})"

    print("KERNEL_OK")
</pallas_src>

<mosaic_0001>
module attributes {stable_mosaic.version = 11 : i64} {
  func.func @_fused_kernel(%arg0: i32, %arg1: i32, %arg2: i32, %arg3: memref<32x128xf32, #tpu.memory_space<vmem>>, %arg4: memref<128x128xbf16, #tpu.memory_space<vmem>>, %arg5: memref<1x128xf32, #tpu.memory_space<vmem>>, %arg6: memref<32x128xf32, #tpu.memory_space<vmem>>) attributes {dimension_semantics = [#tpu.dimension_semantics<parallel>, #tpu.dimension_semantics<parallel>, #tpu.dimension_semantics<arbitrary>], iteration_bounds = array<i64: 1, 1, 1>, scalar_prefetch = 0 : i64, scratch_operands = 0 : i64, tpu.core_type = #tpu.core_type<tc>, window_params = [{transform_indices = @transform_0, window_bounds = array<i64: 32, 128>}, {pipeline_mode = #tpu.pipeline_mode<synchronous>, transform_indices = @transform_1, window_bounds = array<i64: 128, 128>}, {pipeline_mode = #tpu.pipeline_mode<synchronous>, transform_indices = @transform_2, window_bounds = array<i64: 1, 128>}, {transform_indices = @transform_3, window_bounds = array<i64: 32, 128>}]} {
    %c0 = arith.constant 0 : index
    %c0_0 = arith.constant 0 : index
    %0 = vector.load %arg3[%c0, %c0_0] : memref<32x128xf32, #tpu.memory_space<vmem>>, vector<32x128xf32>
    %1 = arith.truncf %0 : vector<32x128xf32> to vector<32x128xbf16>
    %c0_1 = arith.constant 0 : index
    %c0_2 = arith.constant 0 : index
    %2 = vector.load %arg4[%c0_1, %c0_2] : memref<128x128xbf16, #tpu.memory_space<vmem>>, vector<128x128xbf16>
    %cst = arith.constant dense<0.000000e+00> : vector<32x128xf32>
    %3 = tpu.matmul %1, %2, %cst {dimension_numbers = #tpu.dot_dimension_numbers<[1], [0], [0], [1], [0, 0, 1, 1], [], []>} : vector<32x128xbf16>, vector<128x128xbf16>, vector<32x128xf32> -> vector<32x128xf32>
    %c0_3 = arith.constant 0 : index
    %c0_4 = arith.constant 0 : index
    %4 = vector.load %arg5[%c0_3, %c0_4] : memref<1x128xf32, #tpu.memory_space<vmem>>, vector<1x128xf32>
    %5 = vector.broadcast %4 : vector<1x128xf32> to vector<32x128xf32>
    %6 = arith.addf %3, %5 : vector<32x128xf32>
    %cst_5 = arith.constant 0.000000e+00 : f32
    %7 = vector.broadcast %cst_5 : f32 to vector<32x128xf32>
    %8 = arith.maximumf %6, %7 : vector<32x128xf32>
    %c0_6 = arith.constant 0 : index
    %c0_7 = arith.constant 0 : index
    %9 = vector.load %arg6[%c0_6, %c0_7] : memref<32x128xf32, #tpu.memory_space<vmem>>, vector<32x128xf32>
    tpu.vector_store %arg6[%c0_6, %c0_7], %8 {strides = array<i32>} : memref<32x128xf32, #tpu.memory_space<vmem>>, vector<32x128xf32>,
    return
  }
  func.func @transform_0(%arg0: i32, %arg1: i32, %arg2: i32) -> (i32, i32) {
    %c0_i32 = arith.constant 0 : i32
    return %arg0, %arg2 : i32, i32
  }
  func.func @transform_1(%arg0: i32, %arg1: i32, %arg2: i32) -> (i32, i32) {
    %c0_i32 = arith.constant 0 : i32
    return %arg2, %arg1 : i32, i32
  }
  func.func @transform_2(%arg0: i32, %arg1: i32, %arg2: i32) -> (i32, i32) {
    %c0_i32 = arith.constant 0 : i32
    %c0_i32_0 = arith.constant 0 : i32
    return %c0_i32, %arg1 : i32, i32
  }
  func.func @transform_3(%arg0: i32, %arg1: i32, %arg2: i32) -> (i32, i32) {
    %c0_i32 = arith.constant 0 : i32
    return %arg0, %arg1 : i32, i32
  }
}

</mosaic_0001>

<bundles_post_ra>
// kernel: shuffle_unit_apply.1
= control target key start
LH: loop header
LB: loop body
LE: loop exit
PB: predicated region body
PF: predicated region fallthrough
CT: control target
= control target key end

     0   :  { %s271_s1 = inlined_call_operand.vmem [shape: bf16[128,128], index: 1, kind: input, shape index: {}]   ;;  %s272_s0 = inlined_call_operand.vmem [shape: f32[32,128], index: 0, kind: input, shape index: {}]   ;;  %s273_s2 = inlined_call_operand.vmem [shape: f32[1,128], index: 2, kind: input, shape index: {}]   ;;  %s274_s3 = inlined_call_operand.vmem [shape: f32[32,128], index: 3, kind: output, shape index: {}]  }
   0x1   :  { %v192_v0 = vld [vmem:[%s271_s1 + $0x38] sm:$0xff]   ;;  %v193_v1 = vld [vmem:[%s271_s1 + $0x30] sm:$0xff]   ;;  %v194_v2 = vld [vmem:[%s271_s1 + $0x28] sm:$0xff]  }
   0x2   :  { %172 = vmatprep.subr.bf16.mxu0 %v192_v0  ;;  %v195_v3 = vld [vmem:[%s271_s1 + $0x20] sm:$0xff]   ;;  %v16_v5 = vld [vmem:[%s272_s0 + $0x8] sm:$0xff]  ;;  %v196_v7 = vld [vmem:[%s271_s1 + $0x18] sm:$0xff]  }
   0x3   :  { %173 = vmatpush3.bf16.msra.mxu0 %v192_v0  ;;  %v15_v4 = vld [vmem:[%s272_s0] sm:$0xff]  ;;  %v197_v8 = vld [vmem:[%s271_s1 + $0x10] sm:$0xff]   ;;  %v198_v9 = vld [vmem:[%s271_s1 + $0x8] sm:$0xff]  }
   0x4   :  { %174 = vmatprep.subr.bf16.mxu0 %v193_v1  ;;  %v19_v6 = vpack.c.bf16 %v16_v5, %v15_v4  ;;  %v199_v10 = vld [vmem:[%s271_s1] sm:$0xff]   ;;  %v17_v11 = vld [vmem:[%s272_s0 + $0x10] sm:$0xff]  ;;  %v18_v12 = vld [vmem:[%s272_s0 + $0x18] sm:$0xff] }
   0x5   :  { %v20_v13 = vpack.c.bf16 %v18_v12, %v17_v11  ;;  %v153_v14 = vld [vmem:[%s273_s2] ss:$0 sm:$0xff] }
   0x6   :  { %188 = vmatprep.mubr.bf16.mxu0 %v19_v6 }
   0x7   :  { %175 = vmatpush3.bf16.msra.mxu0 %v193_v1 }
   0x8   :  { %176 = vmatprep.subr.bf16.mxu0 %v194_v2 }
   0xb   :  { %177 = vmatpush3.bf16.msra.mxu0 %v194_v2 }
   0xc   :  { %178 = vmatprep.subr.bf16.mxu0 %v195_v3 }
   0xf   :  { %179 = vmatpush3.bf16.msra.mxu0 %v195_v3 }
  0x10   :  { %180 = vmatprep.subr.bf16.mxu0 %v196_v7 }
  0x13   :  { %181 = vmatpush3.bf16.msra.mxu0 %v196_v7 }
  0x14   :  { %182 = vmatprep.subr.bf16.mxu0 %v197_v8 }
  0x17   :  { %183 = vmatpush3.bf16.msra.mxu0 %v197_v8 }
  0x18   :  { %184 = vmatprep.subr.bf16.mxu0 %v198_v9 }
  0x1b   :  { %185 = vmatpush3.bf16.msra.mxu0 %v198_v9 }
  0x1c   :  { %186 = vmatprep.subr.bf16.mxu0 %v199_v10 }
  0x1f   :  { %187 = vmatpush3.bf16.msra.mxu0 %v199_v10 }
  0x22   :  { %189 = vmatmul.mubr.bf16.vlgmr.msra.gmra.mxu0 %v20_v13 }
  0xe2   :  { %v190_v15 = vpop.f32.mrf.mxu0 }
  0xe3   :  { %v135_v16 = vadd.f32 %v190_v15, %v153_v14 }
  0xe4   :  { %v126_v17 = vpop.f32.mrf.mxu0 }
  0xe5   :  { %v143_v18 = vmax.f32 %v135_v16, 0.0  ;;  %v127_v19 = vadd.f32 %v153_v14, %v126_v17 }
  0xe6   :  { %v191_v20 = vpop.f32.mrf.mxu0 }
  0xe7   :  { %147 = vst [vmem:[%s274_s3 + $0x10] sm:$0xff] %v143_v18  ;;  %v141_v21 = vmax.f32 %v127_v19, 0.0  ;;  %v138_v22 = vadd.f32 %v191_v20, %v153_v14 }
  0xe8   :  { %v129_v23 = vpop.f32.mrf.mxu0 }
  0xe9   :  { %145 = vst [vmem:[%s274_s3] sm:$0xff] %v141_v21  ;;  %v144_v24 = vmax.f32 %v138_v22, 0.0  ;;  %v130_v25 = vadd.f32 %v153_v14, %v129_v23 }
  0xeb   :  { %148 = vst [vmem:[%s274_s3 + $0x18] sm:$0xff] %v144_v24  ;;  %v142_v26 = vmax.f32 %v130_v25, 0.0 }
  0xed   :  { %146 = vst [vmem:[%s274_s3 + $0x8] sm:$0xff] %v142_v26 }

</bundles_post_ra>
